<compile_context>
chip_gen: v5e
topology: v5e:2x2
jax: 0.10.0
libtpu: 0.0.40
codegen_flags: <defaults>
</compile_context>

<pallas_src>
import math
from functools import partial

import jax
import jax.numpy as jnp
from jax.experimental import pallas as pl
from jax.experimental.pallas import tpu as pltpu

# ---- small, forward-consistent config ----
VOCAB = 128
D_MODEL = 32
NHEAD = 4
HEAD_DIM = D_MODEL // NHEAD
NUM_LAYERS = 2
D_FF = 64
MAX_LEN = 16
PAD_IDX = 0
EPS = 1e-5                 # torch LayerNorm default
NUM_SMALL_ROWS = 8         # per-layer packed bias/LN slab: (8, 128)


# --------------------------------------------------------------------------
# Positional encoding table (same formula as the PyTorch PositionalEncoding)
# --------------------------------------------------------------------------
def make_positional_encoding(max_len, d_model):
    position = jnp.arange(max_len, dtype=jnp.float32)[:, None]
    div_term = jnp.exp(
        jnp.arange(0, d_model, 2, dtype=jnp.float32) * (-math.log(10000.0) / d_model)
    )
    pe = jnp.zeros((max_len, d_model), jnp.float32)
    pe = pe.at[:, 0::2].set(jnp.sin(position * div_term))
    pe = pe.at[:, 1::2].set(jnp.cos(position * div_term))
    return pe


# --------------------------------------------------------------------------
# Single fused kernel: embed + PE + NUM_LAYERS encoder layers + fc_out
# (one grid step == one batch element; all weights VMEM-resident)
# --------------------------------------------------------------------------
def fused_forward_kernel(ids_ref, pe_ref, hmask_ref, emb_ref, wqkv_ref, wo_ref,
                         w1_ref, w2_ref, small_ref, wout_ref, bout_ref, o_ref,
                         *, seq):
    d = D_MODEL

    # ---- embedding gather as one-hot matmul (VOCAB = 128 lanes, emb pre-scaled) ----
    ids = ids_ref[...]                                                   # (S, 1) int32
    vocab_iota = jax.lax.broadcasted_iota(jnp.int32, (seq, VOCAB), 1)
    onehot = (ids == vocab_iota).astype(jnp.bfloat16)                    # (S, V)
    x = jnp.dot(onehot, emb_ref[...], preferred_element_type=jnp.float32)
    x = x + pe_ref[...]                                                  # (S, D) f32

    # head mask: hmask[r, c] = 1 iff lane c belongs to head r // seq (host constant)
    hmask_f = hmask_ref[...]                                             # (H*S, D) f32

    def layer_norm(v, g, b):
        mu = jnp.mean(v, axis=-1, keepdims=True)
        vc = v - mu
        var = jnp.mean(vc * vc, axis=-1, keepdims=True)
        return vc * jax.lax.rsqrt(var + EPS) * g + b

    for l in range(NUM_LAYERS):
        small = small_ref[l]                                             # (8, 128) f32
        bqkv = small[0:1, :3 * d]
        bo = small[1:2, :d]
        g1, be1 = small[2:3, :d], small[3:4, :d]
        b1 = small[4:5, :D_FF]
        b2 = small[5:6, :d]
        g2, be2 = small[6:7, :d], small[7:8, :d]

        # fused Q/K/V projection: one (S, D) @ (D, 3D) MXU push
        qkv = jnp.dot(x.astype(jnp.bfloat16), wqkv_ref[l],
                      preferred_element_type=jnp.float32) + bqkv         # (S, 3D)
        q = qkv[:, :d]              # 1/sqrt(head_dim) pre-folded into Wq / bq
        k = qkv[:, d:2 * d]
        v = qkv[:, 2 * d:3 * d]

        # all heads fused: row r of k_blk / v_blk is (head r // S, key pos r % S)
        k_blk = (jnp.tile(k, (NHEAD, 1)) * hmask_f).astype(jnp.bfloat16)  # (H*S, D)
        v_blk = (jnp.tile(v, (NHEAD, 1)) * hmask_f).astype(jnp.bfloat16)

        s = jax.lax.dot_general(q.astype(jnp.bfloat16), k_blk,
                                (((1,), (1,)), ((), ())),
                                preferred_element_type=jnp.float32)       # (S, H*S)
        # global row max is a valid stabilizer; normalization below is per-head.
        s = s - jnp.max(s, axis=-1, keepdims=True)
        p = jnp.exp(s)
        # per-head softmax denominator broadcast onto that head's lanes (mask matmul)
        denom = jnp.dot(p, hmask_f, preferred_element_type=jnp.float32)   # (S, D)
        attn = jnp.dot(p.astype(jnp.bfloat16), v_blk,
                       preferred_element_type=jnp.float32)                # (S, D)
        attn = attn * pl.reciprocal(denom, approx=True)

        attn = jnp.dot(attn.astype(jnp.bfloat16), wo_ref[l],
                       preferred_element_type=jnp.float32) + bo

        # residual + LayerNorm1 (post-norm), feed-forward, residual + LayerNorm2
        x1 = layer_norm(x + attn, g1, be1)
        h1 = jnp.maximum(
            jnp.dot(x1.astype(jnp.bfloat16), w1_ref[l],
                    preferred_element_type=jnp.float32) + b1, 0.0)
        ff = jnp.dot(h1.astype(jnp.bfloat16), w2_ref[l],
                     preferred_element_type=jnp.float32) + b2
        x = layer_norm(x1 + ff, g2, be2)

    # final projection -> logits (lane-dense: last dim = 128)
    o_ref[...] = (jnp.dot(x.astype(jnp.bfloat16), wout_ref[...],
                          preferred_element_type=jnp.float32) + bout_ref[...])


# --------------------------------------------------------------------------
# Parameter init (deterministic, PyTorch shapes)
# --------------------------------------------------------------------------
def init_params(key):
    keys = jax.random.split(key, 2 + NUM_LAYERS)
    emb = 0.02 * jax.random.normal(keys[0], (VOCAB, D_MODEL), jnp.float32)
    emb = emb.at[PAD_IDX].set(0.0)  # padding_idx row is zero

    layers = []
    for l in range(NUM_LAYERS):
        k = jax.random.split(keys[1 + l], 12)
        wqkv = 0.05 * jax.random.normal(k[0], (3 * D_MODEL, D_MODEL), jnp.float32)
        bqkv = 0.02 * jax.random.normal(k[1], (1, 3 * D_MODEL), jnp.float32)
        wo = 0.05 * jax.random.normal(k[2], (D_MODEL, D_MODEL), jnp.float32)
        bo = 0.02 * jax.random.normal(k[3], (1, D_MODEL), jnp.float32)
        g1 = 1.0 + 0.02 * jax.random.normal(k[4], (1, D_MODEL), jnp.float32)
        be1 = 0.02 * jax.random.normal(k[5], (1, D_MODEL), jnp.float32)
        w1 = 0.05 * jax.random.normal(k[6], (D_FF, D_MODEL), jnp.float32)
        b1 = 0.02 * jax.random.normal(k[7], (1, D_FF), jnp.float32)
        w2 = 0.05 * jax.random.normal(k[8], (D_MODEL, D_FF), jnp.float32)
        b2 = 0.02 * jax.random.normal(k[9], (1, D_MODEL), jnp.float32)
        g2 = 1.0 + 0.02 * jax.random.normal(k[10], (1, D_MODEL), jnp.float32)
        be2 = 0.02 * jax.random.normal(k[11], (1, D_MODEL), jnp.float32)
        layers.append((wqkv, bqkv, wo, bo, g1, be1, w1, b1, w2, b2, g2, be2))

    w_out = 0.05 * jax.random.normal(keys[-1], (VOCAB, D_MODEL), jnp.float32)
    b_out = 0.02 * jax.random.normal(jax.random.fold_in(keys[-1], 1),
                                     (1, VOCAB), jnp.float32)
    return emb, layers, w_out, b_out


# --------------------------------------------------------------------------
# One-time host-side packing (NOT in the per-call path)
# --------------------------------------------------------------------------
def pack_params(emb, layers, w_out, b_out):
    d = D_MODEL
    scale = 1.0 / math.sqrt(HEAD_DIM)
    wqkv_l, wo_l, w1_l, w2_l, small_l = [], [], [], [], []
    for (wqkv, bqkv, wo, bo, g1, be1, w1, b1, w2, b2, g2, be2) in layers:
        wqkv_t = wqkv.T                                # (D, 3D), cols = [Q|K|V]
        wqkv_t = wqkv_t.at[:, :d].multiply(scale)      # fold 1/sqrt(hd) into Q
        bqkv_s = bqkv.at[:, :d].multiply(scale)
        wqkv_l.append(wqkv_t.astype(jnp.bfloat16))
        wo_l.append(wo.T.astype(jnp.bfloat16))
        w1_l.append(w1.T.astype(jnp.bfloat16))
        w2_l.append(w2.T.astype(jnp.bfloat16))
        slab = jnp.zeros((NUM_SMALL_ROWS, 128), jnp.float32)
        for r, vec in enumerate([bqkv_s, bo, g1, be1, b1, b2, g2, be2]):
            slab = slab.at[r, :vec.shape[-1]].set(vec[0])
        small_l.append(slab)
    return dict(
        emb=(emb * math.sqrt(d)).astype(jnp.bfloat16),   # pre-scaled by sqrt(d)
        wqkv=jnp.stack(wqkv_l),                          # (L, D, 3D) bf16
        wo=jnp.stack(wo_l),                              # (L, D, D)  bf16
        w1=jnp.stack(w1_l),                              # (L, D, D_FF) bf16
        w2=jnp.stack(w2_l),                              # (L, D_FF, D) bf16
        small=jnp.stack(small_l),                        # (L, 8, 128) f32
        wout=w_out.T.astype(jnp.bfloat16),               # (D, V) bf16
        bout=b_out,                                      # (1, V) f32
    )


def make_constants(seq, pe):
    """Shape-dependent constants, built once per sequence length."""
    rows = jnp.arange(NHEAD * seq, dtype=jnp.int32)[:, None] // seq
    lanes = jnp.arange(D_MODEL, dtype=jnp.int32)[None, :] // HEAD_DIM
    hmask = (rows == lanes).astype(jnp.float32)          # (NHEAD*S, D)
    return {"pe": pe[:seq], "hmask": hmask}


# --------------------------------------------------------------------------
# Full forward: ONE pallas_call, grid over the batch ("parallel" for megacore)
# --------------------------------------------------------------------------
def poetry_transformer_forward(src, packed, consts):
    B, S = src.shape
    ids = src.reshape(B * S, 1).astype(jnp.int32)

    def resident2(a):
        return pl.BlockSpec(a.shape, lambda b: (0, 0))

    def resident3(a):
        return pl.BlockSpec(a.shape, lambda b: (0, 0, 0))

    in_specs = [
        pl.BlockSpec((S, 1), lambda b: (b, 0)),          # ids: per-batch tile
        resident2(consts["pe"]),
        resident2(consts["hmask"]),
        resident2(packed["emb"]),
        resident3(packed["wqkv"]),
        resident3(packed["wo"]),
        resident3(packed["w1"]),
        resident3(packed["w2"]),
        resident3(packed["small"]),
        resident2(packed["wout"]),
        resident2(packed["bout"]),
    ]

    logits_flat = pl.pallas_call(
        partial(fused_forward_kernel, seq=S),
        out_shape=jax.ShapeDtypeStruct((B * S, VOCAB), jnp.float32),
        grid=(B,),
        in_specs=in_specs,
        out_specs=pl.BlockSpec((S, VOCAB), lambda b: (b, 0)),
        compiler_params=pltpu.CompilerParams(dimension_semantics=("parallel",)),
    )(ids, consts["pe"], consts["hmask"], packed["emb"], packed["wqkv"],
      packed["wo"], packed["w1"], packed["w2"], packed["small"],
      packed["wout"], packed["bout"])
    return logits_flat.reshape(B, S, VOCAB)


# --------------------------------------------------------------------------
# Pure-JAX reference (sanity check, full f32)
# --------------------------------------------------------------------------
def reference_forward(src, emb, layers, w_out, b_out, pe):
    B, S = src.shape
    x = jnp.take(emb, src, axis=0) * math.sqrt(D_MODEL) + pe[:S][None]
    hd = HEAD_DIM
    for (wqkv, bqkv, wo, bo, g1, be1, w1, b1, w2, b2, g2, be2) in layers:
        qkv = x @ wqkv.T + bqkv
        q, k, v = (qkv[..., :D_MODEL], qkv[..., D_MODEL:2 * D_MODEL],
                   qkv[..., 2 * D_MODEL:])

        def split(t):
            return t.reshape(B, S, NHEAD, hd).transpose(0, 2, 1, 3)

        qh, kh, vh = split(q), split(k), split(v)
        s = (qh / math.sqrt(hd)) @ kh.transpose(0, 1, 3, 2)
        p = jax.nn.softmax(s, axis=-1)
        attn = (p @ vh).transpose(0, 2, 1, 3).reshape(B, S, D_MODEL)
        attn = attn @ wo.T + bo

        x1 = x + attn
        mu = x1.mean(-1, keepdims=True)
        var = ((x1 - mu) ** 2).mean(-1, keepdims=True)
        x1 = (x1 - mu) / jnp.sqrt(var + EPS) * g1 + be1

        ff = jnp.maximum(x1 @ w1.T + b1, 0.0) @ w2.T + b2
        x2 = x1 + ff
        mu = x2.mean(-1, keepdims=True)
        var = ((x2 - mu) ** 2).mean(-1, keepdims=True)
        x = (x2 - mu) / jnp.sqrt(var + EPS) * g2 + be2
    return x @ w_out.T + b_out


if __name__ == "__main__":
    key = jax.random.PRNGKey(0)
    kp, kx = jax.random.split(key)

    emb, layers, w_out, b_out = init_params(kp)
    pe = make_positional_encoding(MAX_LEN, D_MODEL)

    B, S = 2, 8
    src = jax.random.randint(kx, (B, S), 1, VOCAB, dtype=jnp.int32)  # avoid pad idx

    # One-time packing (hoisted out of the per-call path).
    packed = pack_params(emb, layers, w_out, b_out)
    consts = make_constants(S, pe)
    packed = jax.device_put(packed)
    consts = jax.device_put(consts)

    forward = jax.jit(poetry_transformer_forward)
    logits = forward(src, packed, consts)
    logits = jax.block_until_ready(logits)

    ref = reference_forward(src, emb, layers, w_out, b_out, pe)
    assert logits.shape == (B, S, VOCAB), logits.shape
    assert jnp.allclose(logits, ref, atol=3e-2, rtol=3e-2), (
        float(jnp.max(jnp.abs(logits - ref)))
    )

    print("KERNEL_OK")
</pallas_src>

<mosaic_0001>
module attributes {stable_mosaic.version = 11 : i64} {
  func.func @fused_forward_kernel(%arg0: i32, %arg1: memref<8x1xi32, #tpu.memory_space<vmem>>, %arg2: memref<8x32xf32, #tpu.memory_space<vmem>>, %arg3: memref<32x32xf32, #tpu.memory_space<vmem>>, %arg4: memref<128x32xbf16, #tpu.memory_space<vmem>>, %arg5: memref<2x32x96xbf16, #tpu.memory_space<vmem>>, %arg6: memref<2x32x32xbf16, #tpu.memory_space<vmem>>, %arg7: memref<2x32x64xbf16, #tpu.memory_space<vmem>>, %arg8: memref<2x64x32xbf16, #tpu.memory_space<vmem>>, %arg9: memref<2x8x128xf32, #tpu.memory_space<vmem>>, %arg10: memref<32x128xbf16, #tpu.memory_space<vmem>>, %arg11: memref<1x128xf32, #tpu.memory_space<vmem>>, %arg12: memref<8x128xf32, #tpu.memory_space<vmem>>) attributes {dimension_semantics = [#tpu.dimension_semantics<parallel>], iteration_bounds = array<i64: 2>, scalar_prefetch = 0 : i64, scratch_operands = 0 : i64, tpu.core_type = #tpu.core_type<tc>, window_params = [{transform_indices = @transform_0, window_bounds = array<i64: 8, 1>}, {pipeline_mode = #tpu.pipeline_mode<synchronous>, transform_indices = @transform_1, window_bounds = array<i64: 8, 32>}, {pipeline_mode = #tpu.pipeline_mode<synchronous>, transform_indices = @transform_2, window_bounds = array<i64: 32, 32>}, {pipeline_mode = #tpu.pipeline_mode<synchronous>, transform_indices = @transform_3, window_bounds = array<i64: 128, 32>}, {pipeline_mode = #tpu.pipeline_mode<synchronous>, transform_indices = @transform_4, window_bounds = array<i64: 2, 32, 96>}, {pipeline_mode = #tpu.pipeline_mode<synchronous>, transform_indices = @transform_5, window_bounds = array<i64: 2, 32, 32>}, {pipeline_mode = #tpu.pipeline_mode<synchronous>, transform_indices = @transform_6, window_bounds = array<i64: 2, 32, 64>}, {pipeline_mode = #tpu.pipeline_mode<synchronous>, transform_indices = @transform_7, window_bounds = array<i64: 2, 64, 32>}, {pipeline_mode = #tpu.pipeline_mode<synchronous>, transform_indices = @transform_8, window_bounds = array<i64: 2, 8, 128>}, {pipeline_mode = #tpu.pipeline_mode<synchronous>, transform_indices = @transform_9, window_bounds = array<i64: 32, 128>}, {pipeline_mode = #tpu.pipeline_mode<synchronous>, transform_indices = @transform_10, window_bounds = array<i64: 1, 128>}, {transform_indices = @transform_11, window_bounds = array<i64: 8, 128>}]} {
    %c0 = arith.constant 0 : index
    %c0_0 = arith.constant 0 : index
    %0 = vector.load %arg1[%c0, %c0_0] : memref<8x1xi32, #tpu.memory_space<vmem>>, vector<8x1xi32>
    %1 = tpu.iota {dimensions = array<i32: 1>} : vector<8x128xi32>
    %2 = vector.broadcast %0 : vector<8x1xi32> to vector<8x128xi32>
    %3 = arith.cmpi eq, %2, %1 : vector<8x128xi32>
    %4 = arith.extui %3 : vector<8x128xi1> to vector<8x128xi32>
    %5 = arith.sitofp %4 : vector<8x128xi32> to vector<8x128xf32>
    %6 = arith.truncf %5 : vector<8x128xf32> to vector<8x128xbf16>
    %c0_1 = arith.constant 0 : index
    %c0_2 = arith.constant 0 : index
    %7 = vector.load %arg4[%c0_1, %c0_2] : memref<128x32xbf16, #tpu.memory_space<vmem>>, vector<128x32xbf16>
    %cst = arith.constant dense<0.000000e+00> : vector<8x32xf32>
    %8 = tpu.matmul %6, %7, %cst {dimension_numbers = #tpu.dot_dimension_numbers<[1], [0], [0], [1], [0, 0, 1, 1], [], []>} : vector<8x128xbf16>, vector<128x32xbf16>, vector<8x32xf32> -> vector<8x32xf32>
    %c0_3 = arith.constant 0 : index
    %c0_4 = arith.constant 0 : index
    %9 = vector.load %arg2[%c0_3, %c0_4] : memref<8x32xf32, #tpu.memory_space<vmem>>, vector<8x32xf32>
    %10 = arith.addf %8, %9 : vector<8x32xf32>
    %c0_5 = arith.constant 0 : index
    %c0_6 = arith.constant 0 : index
    %11 = vector.load %arg3[%c0_5, %c0_6] : memref<32x32xf32, #tpu.memory_space<vmem>>, vector<32x32xf32>
    %c0_7 = arith.constant 0 : index
    %c0_8 = arith.constant 0 : index
    %c0_9 = arith.constant 0 : index
    %12 = vector.load %arg9[%c0_7, %c0_8, %c0_9] : memref<2x8x128xf32, #tpu.memory_space<vmem>>, vector<1x8x128xf32>
    %13 = vector.shape_cast %12 : vector<1x8x128xf32> to vector<8x128xf32>
    %14 = vector.extract_strided_slice %13 {offsets = [0, 0], sizes = [1, 96], strides = [1, 1]} : vector<8x128xf32> to vector<1x96xf32>
    %15 = vector.extract_strided_slice %13 {offsets = [1, 0], sizes = [1, 32], strides = [1, 1]} : vector<8x128xf32> to vector<1x32xf32>
    %16 = vector.extract_strided_slice %13 {offsets = [2, 0], sizes = [1, 32], strides = [1, 1]} : vector<8x128xf32> to vector<1x32xf32>
    %17 = vector.extract_strided_slice %13 {offsets = [3, 0], sizes = [1, 32], strides = [1, 1]} : vector<8x128xf32> to vector<1x32xf32>
    %18 = vector.extract_strided_slice %13 {offsets = [4, 0], sizes = [1, 64], strides = [1, 1]} : vector<8x128xf32> to vector<1x64xf32>
    %19 = vector.extract_strided_slice %13 {offsets = [5, 0], sizes = [1, 32], strides = [1, 1]} : vector<8x128xf32> to vector<1x32xf32>
    %20 = vector.extract_strided_slice %13 {offsets = [6, 0], sizes = [1, 32], strides = [1, 1]} : vector<8x128xf32> to vector<1x32xf32>
    %21 = vector.extract_strided_slice %13 {offsets = [7, 0], sizes = [1, 32], strides = [1, 1]} : vector<8x128xf32> to vector<1x32xf32>
    %22 = arith.truncf %10 : vector<8x32xf32> to vector<8x32xbf16>
    %c0_10 = arith.constant 0 : index
    %c0_11 = arith.constant 0 : index
    %c0_12 = arith.constant 0 : index
    %23 = vector.load %arg5[%c0_10, %c0_11, %c0_12] : memref<2x32x96xbf16, #tpu.memory_space<vmem>>, vector<1x32x96xbf16>
    %24 = vector.shape_cast %23 : vector<1x32x96xbf16> to vector<32x96xbf16>
    %cst_13 = arith.constant dense<0.000000e+00> : vector<8x96xf32>
    %25 = tpu.matmul %22, %24, %cst_13 {dimension_numbers = #tpu.dot_dimension_numbers<[1], [0], [0], [1], [0, 0, 1, 1], [], []>} : vector<8x32xbf16>, vector<32x96xbf16>, vector<8x96xf32> -> vector<8x96xf32>
    %26 = vector.broadcast %14 : vector<1x96xf32> to vector<8x96xf32>
    %27 = arith.addf %25, %26 : vector<8x96xf32>
    %28 = vector.extract_strided_slice %27 {offsets = [0, 0], sizes = [8, 32], strides = [1, 1]} : vector<8x96xf32> to vector<8x32xf32>
    %29 = vector.extract_strided_slice %27 {offsets = [0, 32], sizes = [8, 32], strides = [1, 1]} : vector<8x96xf32> to vector<8x32xf32>
    %30 = vector.extract_strided_slice %27 {offsets = [0, 64], sizes = [8, 32], strides = [1, 1]} : vector<8x96xf32> to vector<8x32xf32>
    %31 = tpu.concatenate %29, %29, %29, %29 in 0 : vector<8x32xf32>, vector<8x32xf32>, vector<8x32xf32>, vector<8x32xf32> -> vector<32x32xf32>
    %32 = arith.mulf %31, %11 : vector<32x32xf32>
    %33 = arith.truncf %32 : vector<32x32xf32> to vector<32x32xbf16>
    %34 = tpu.concatenate %30, %30, %30, %30 in 0 : vector<8x32xf32>, vector<8x32xf32>, vector<8x32xf32>, vector<8x32xf32> -> vector<32x32xf32>
    %35 = arith.mulf %34, %11 : vector<32x32xf32>
    %36 = arith.truncf %35 : vector<32x32xf32> to vector<32x32xbf16>
    %37 = arith.truncf %28 : vector<8x32xf32> to vector<8x32xbf16>
    %cst_14 = arith.constant dense<0.000000e+00> : vector<8x32xf32>
    %38 = tpu.matmul %37, %33, %cst_14 {dimension_numbers = #tpu.dot_dimension_numbers<[1], [1], [0], [0], [0, 0, 1, 0], [], []>} : vector<8x32xbf16>, vector<32x32xbf16>, vector<8x32xf32> -> vector<8x32xf32>
    %cst_15 = arith.constant dense<0xFF800000> : vector<8xf32>
    %39 = vector.multi_reduction <maximumf>, %38, %cst_15 [1] : vector<8x32xf32> to vector<8xf32>
    %40 = vector.shape_cast %39 : vector<8xf32> to vector<8x1xf32>
    %41 = vector.broadcast %40 : vector<8x1xf32> to vector<8x32xf32>
    %42 = arith.subf %38, %41 : vector<8x32xf32>
    %43 = math.exp %42 : vector<8x32xf32>
    %cst_16 = arith.constant dense<0.000000e+00> : vector<8x32xf32>
    %44 = tpu.matmul %43, %11, %cst_16 {dimension_numbers = #tpu.dot_dimension_numbers<[1], [0], [0], [1], [0, 0, 1, 1], [], []>} : vector<8x32xf32>, vector<32x32xf32>, vector<8x32xf32> -> vector<8x32xf32>
    %45 = arith.truncf %43 : vector<8x32xf32> to vector<8x32xbf16>
    %cst_17 = arith.constant dense<0.000000e+00> : vector<8x32xf32>
    %46 = tpu.matmul %45, %36, %cst_17 {dimension_numbers = #tpu.dot_dimension_numbers<[1], [0], [0], [1], [0, 0, 1, 1], [], []>} : vector<8x32xbf16>, vector<32x32xbf16>, vector<8x32xf32> -> vector<8x32xf32>
    %47 = tpu.reciprocal %44 {approx = true} : vector<8x32xf32> -> vector<8x32xf32>
    %48 = arith.mulf %46, %47 : vector<8x32xf32>
    %49 = arith.truncf %48 : vector<8x32xf32> to vector<8x32xbf16>
    %c0_18 = arith.constant 0 : index
    %c0_19 = arith.constant 0 : index
    %c0_20 = arith.constant 0 : index
    %50 = vector.load %arg6[%c0_18, %c0_19, %c0_20] : memref<2x32x32xbf16, #tpu.memory_space<vmem>>, vector<1x32x32xbf16>
    %51 = vector.shape_cast %50 : vector<1x32x32xbf16> to vector<32x32xbf16>
    %cst_21 = arith.constant dense<0.000000e+00> : vector<8x32xf32>
    %52 = tpu.matmul %49, %51, %cst_21 {dimension_numbers = #tpu.dot_dimension_numbers<[1], [0], [0], [1], [0, 0, 1, 1], [], []>} : vector<8x32xbf16>, vector<32x32xbf16>, vector<8x32xf32> -> vector<8x32xf32>
    %53 = vector.broadcast %15 : vector<1x32xf32> to vector<8x32xf32>
    %54 = arith.addf %52, %53 : vector<8x32xf32>
    %55 = arith.addf %10, %54 : vector<8x32xf32>
    %cst_22 = arith.constant dense<0.000000e+00> : vector<8xf32>
    %56 = vector.multi_reduction <add>, %55, %cst_22 [1] : vector<8x32xf32> to vector<8xf32>
    %57 = vector.shape_cast %56 : vector<8xf32> to vector<8x1xf32>
    %cst_23 = arith.constant 3.200000e+01 : f32
    %58 = vector.broadcast %cst_23 : f32 to vector<8x1xf32>
    %59 = arith.divf %57, %58 : vector<8x1xf32>
    %60 = vector.broadcast %59 : vector<8x1xf32> to vector<8x32xf32>
    %61 = arith.subf %55, %60 : vector<8x32xf32>
    %62 = arith.mulf %61, %61 : vector<8x32xf32>
    %cst_24 = arith.constant dense<0.000000e+00> : vector<8xf32>
    %63 = vector.multi_reduction <add>, %62, %cst_24 [1] : vector<8x32xf32> to vector<8xf32>
    %64 = vector.shape_cast %63 : vector<8xf32> to vector<8x1xf32>
    %cst_25 = arith.constant 3.200000e+01 : f32
    %65 = vector.broadcast %cst_25 : f32 to vector<8x1xf32>
    %66 = arith.divf %64, %65 : vector<8x1xf32>
    %cst_26 = arith.constant 9.99999974E-6 : f32
    %67 = vector.broadcast %cst_26 : f32 to vector<8x1xf32>
    %68 = arith.addf %66, %67 : vector<8x1xf32>
    %69 = math.rsqrt %68 : vector<8x1xf32>
    %70 = vector.broadcast %69 : vector<8x1xf32> to vector<8x32xf32>
    %71 = arith.mulf %61, %70 : vector<8x32xf32>
    %72 = vector.broadcast %16 : vector<1x32xf32> to vector<8x32xf32>
    %73 = arith.mulf %71, %72 : vector<8x32xf32>
    %74 = vector.broadcast %17 : vector<1x32xf32> to vector<8x32xf32>
    %75 = arith.addf %73, %74 : vector<8x32xf32>
    %76 = arith.truncf %75 : vector<8x32xf32> to vector<8x32xbf16>
    %c0_27 = arith.constant 0 : index
    %c0_28 = arith.constant 0 : index
    %c0_29 = arith.constant 0 : index
    %77 = vector.load %arg7[%c0_27, %c0_28, %c0_29] : memref<2x32x64xbf16, #tpu.memory_space<vmem>>, vector<1x32x64xbf16>
    %78 = vector.shape_cast %77 : vector<1x32x64xbf16> to vector<32x64xbf16>
    %cst_30 = arith.constant dense<0.000000e+00> : vector<8x64xf32>
    %79 = tpu.matmul %76, %78, %cst_30 {dimension_numbers = #tpu.dot_dimension_numbers<[1], [0], [0], [1], [0, 0, 1, 1], [], []>} : vector<8x32xbf16>, vector<32x64xbf16>, vector<8x64xf32> -> vector<8x64xf32>
    %80 = vector.broadcast %18 : vector<1x64xf32> to vector<8x64xf32>
    %81 = arith.addf %79, %80 : vector<8x64xf32>
    %cst_31 = arith.constant 0.000000e+00 : f32
    %82 = vector.broadcast %cst_31 : f32 to vector<8x64xf32>
    %83 = arith.maximumf %81, %82 : vector<8x64xf32>
    %84 = arith.truncf %83 : vector<8x64xf32> to vector<8x64xbf16>
    %c0_32 = arith.constant 0 : index
    %c0_33 = arith.constant 0 : index
    %c0_34 = arith.constant 0 : index
    %85 = vector.load %arg8[%c0_32, %c0_33, %c0_34] : memref<2x64x32xbf16, #tpu.memory_space<vmem>>, vector<1x64x32xbf16>
    %86 = vector.shape_cast %85 : vector<1x64x32xbf16> to vector<64x32xbf16>
    %cst_35 = arith.constant dense<0.000000e+00> : vector<8x32xf32>
    %87 = tpu.matmul %84, %86, %cst_35 {dimension_numbers = #tpu.dot_dimension_numbers<[1], [0], [0], [1], [0, 0, 1, 1], [], []>} : vector<8x64xbf16>, vector<64x32xbf16>, vector<8x32xf32> -> vector<8x32xf32>
    %88 = vector.broadcast %19 : vector<1x32xf32> to vector<8x32xf32>
    %89 = arith.addf %87, %88 : vector<8x32xf32>
    %90 = arith.addf %75, %89 : vector<8x32xf32>
    %cst_36 = arith.constant dense<0.000000e+00> : vector<8xf32>
    %91 = vector.multi_reduction <add>, %90, %cst_36 [1] : vector<8x32xf32> to vector<8xf32>
    %92 = vector.shape_cast %91 : vector<8xf32> to vector<8x1xf32>
    %cst_37 = arith.constant 3.200000e+01 : f32
    %93 = vector.broadcast %cst_37 : f32 to vector<8x1xf32>
    %94 = arith.divf %92, %93 : vector<8x1xf32>
    %95 = vector.broadcast %94 : vector<8x1xf32> to vector<8x32xf32>
    %96 = arith.subf %90, %95 : vector<8x32xf32>
    %97 = arith.mulf %96, %96 : vector<8x32xf32>
    %cst_38 = arith.constant dense<0.000000e+00> : vector<8xf32>
    %98 = vector.multi_reduction <add>, %97, %cst_38 [1] : vector<8x32xf32> to vector<8xf32>
    %99 = vector.shape_cast %98 : vector<8xf32> to vector<8x1xf32>
    %cst_39 = arith.constant 3.200000e+01 : f32
    %100 = vector.broadcast %cst_39 : f32 to vector<8x1xf32>
    %101 = arith.divf %99, %100 : vector<8x1xf32>
    %cst_40 = arith.constant 9.99999974E-6 : f32
    %102 = vector.broadcast %cst_40 : f32 to vector<8x1xf32>
    %103 = arith.addf %101, %102 : vector<8x1xf32>
    %104 = math.rsqrt %103 : vector<8x1xf32>
    %105 = vector.broadcast %104 : vector<8x1xf32> to vector<8x32xf32>
    %106 = arith.mulf %96, %105 : vector<8x32xf32>
    %107 = vector.broadcast %20 : vector<1x32xf32> to vector<8x32xf32>
    %108 = arith.mulf %106, %107 : vector<8x32xf32>
    %109 = vector.broadcast %21 : vector<1x32xf32> to vector<8x32xf32>
    %110 = arith.addf %108, %109 : vector<8x32xf32>
    %c1 = arith.constant 1 : index
    %c0_41 = arith.constant 0 : index
    %c0_42 = arith.constant 0 : index
    %111 = vector.load %arg9[%c1, %c0_41, %c0_42] : memref<2x8x128xf32, #tpu.memory_space<vmem>>, vector<1x8x128xf32>
    %112 = vector.shape_cast %111 : vector<1x8x128xf32> to vector<8x128xf32>
    %113 = vector.extract_strided_slice %112 {offsets = [0, 0], sizes = [1, 96], strides = [1, 1]} : vector<8x128xf32> to vector<1x96xf32>
    %114 = vector.extract_strided_slice %112 {offsets = [1, 0], sizes = [1, 32], strides = [1, 1]} : vector<8x128xf32> to vector<1x32xf32>
    %115 = vector.extract_strided_slice %112 {offsets = [2, 0], sizes = [1, 32], strides = [1, 1]} : vector<8x128xf32> to vector<1x32xf32>
    %116 = vector.extract_strided_slice %112 {offsets = [3, 0], sizes = [1, 32], strides = [1, 1]} : vector<8x128xf32> to vector<1x32xf32>
    %117 = vector.extract_strided_slice %112 {offsets = [4, 0], sizes = [1, 64], strides = [1, 1]} : vector<8x128xf32> to vector<1x64xf32>
    %118 = vector.extract_strided_slice %112 {offsets = [5, 0], sizes = [1, 32], strides = [1, 1]} : vector<8x128xf32> to vector<1x32xf32>
    %119 = vector.extract_strided_slice %112 {offsets = [6, 0], sizes = [1, 32], strides = [1, 1]} : vector<8x128xf32> to vector<1x32xf32>
    %120 = vector.extract_strided_slice %112 {offsets = [7, 0], sizes = [1, 32], strides = [1, 1]} : vector<8x128xf32> to vector<1x32xf32>
    %121 = arith.truncf %110 : vector<8x32xf32> to vector<8x32xbf16>
    %c1_43 = arith.constant 1 : index
    %c0_44 = arith.constant 0 : index
    %c0_45 = arith.constant 0 : index
    %122 = vector.load %arg5[%c1_43, %c0_44, %c0_45] : memref<2x32x96xbf16, #tpu.memory_space<vmem>>, vector<1x32x96xbf16>
    %123 = vector.shape_cast %122 : vector<1x32x96xbf16> to vector<32x96xbf16>
    %cst_46 = arith.constant dense<0.000000e+00> : vector<8x96xf32>
    %124 = tpu.matmul %121, %123, %cst_46 {dimension_numbers = #tpu.dot_dimension_numbers<[1], [0], [0], [1], [0, 0, 1, 1], [], []>} : vector<8x32xbf16>, vector<32x96xbf16>, vector<8x96xf32> -> vector<8x96xf32>
    %125 = vector.broadcast %113 : vector<1x96xf32> to vector<8x96xf32>
    %126 = arith.addf %124, %125 : vector<8x96xf32>
    %127 = vector.extract_strided_slice %126 {offsets = [0, 0], sizes = [8, 32], strides = [1, 1]} : vector<8x96xf32> to vector<8x32xf32>
    %128 = vector.extract_strided_slice %126 {offsets = [0, 32], sizes = [8, 32], strides = [1, 1]} : vector<8x96xf32> to vector<8x32xf32>
    %129 = vector.extract_strided_slice %126 {offsets = [0, 64], sizes = [8, 32], strides = [1, 1]} : vector<8x96xf32> to vector<8x32xf32>
    %130 = tpu.concatenate %128, %128, %128, %128 in 0 : vector<8x32xf32>, vector<8x32xf32>, vector<8x32xf32>, vector<8x32xf32> -> vector<32x32xf32>
    %131 = arith.mulf %130, %11 : vector<32x32xf32>
    %132 = arith.truncf %131 : vector<32x32xf32> to vector<32x32xbf16>
    %133 = tpu.concatenate %129, %129, %129, %129 in 0 : vector<8x32xf32>, vector<8x32xf32>, vector<8x32xf32>, vector<8x32xf32> -> vector<32x32xf32>
    %134 = arith.mulf %133, %11 : vector<32x32xf32>
    %135 = arith.truncf %134 : vector<32x32xf32> to vector<32x32xbf16>
    %136 = arith.truncf %127 : vector<8x32xf32> to vector<8x32xbf16>
    %cst_47 = arith.constant dense<0.000000e+00> : vector<8x32xf32>
    %137 = tpu.matmul %136, %132, %cst_47 {dimension_numbers = #tpu.dot_dimension_numbers<[1], [1], [0], [0], [0, 0, 1, 0], [], []>} : vector<8x32xbf16>, vector<32x32xbf16>, vector<8x32xf32> -> vector<8x32xf32>
    %cst_48 = arith.constant dense<0xFF800000> : vector<8xf32>
    %138 = vector.multi_reduction <maximumf>, %137, %cst_48 [1] : vector<8x32xf32> to vector<8xf32>
    %139 = vector.shape_cast %138 : vector<8xf32> to vector<8x1xf32>
    %140 = vector.broadcast %139 : vector<8x1xf32> to vector<8x32xf32>
    %141 = arith.subf %137, %140 : vector<8x32xf32>
    %142 = math.exp %141 : vector<8x32xf32>
    %cst_49 = arith.constant dense<0.000000e+00> : vector<8x32xf32>
    %143 = tpu.matmul %142, %11, %cst_49 {dimension_numbers = #tpu.dot_dimension_numbers<[1], [0], [0], [1], [0, 0, 1, 1], [], []>} : vector<8x32xf32>, vector<32x32xf32>, vector<8x32xf32> -> vector<8x32xf32>
    %144 = arith.truncf %142 : vector<8x32xf32> to vector<8x32xbf16>
    %cst_50 = arith.constant dense<0.000000e+00> : vector<8x32xf32>
    %145 = tpu.matmul %144, %135, %cst_50 {dimension_numbers = #tpu.dot_dimension_numbers<[1], [0], [0], [1], [0, 0, 1, 1], [], []>} : vector<8x32xbf16>, vector<32x32xbf16>, vector<8x32xf32> -> vector<8x32xf32>
    %146 = tpu.reciprocal %143 {approx = true} : vector<8x32xf32> -> vector<8x32xf32>
    %147 = arith.mulf %145, %146 : vector<8x32xf32>
    %148 = arith.truncf %147 : vector<8x32xf32> to vector<8x32xbf16>
    %c1_51 = arith.constant 1 : index
    %c0_52 = arith.constant 0 : index
    %c0_53 = arith.constant 0 : index
    %149 = vector.load %arg6[%c1_51, %c0_52, %c0_53] : memref<2x32x32xbf16, #tpu.memory_space<vmem>>, vector<1x32x32xbf16>
    %150 = vector.shape_cast %149 : vector<1x32x32xbf16> to vector<32x32xbf16>
    %cst_54 = arith.constant dense<0.000000e+00> : vector<8x32xf32>
    %151 = tpu.matmul %148, %150, %cst_54 {dimension_numbers = #tpu.dot_dimension_numbers<[1], [0], [0], [1], [0, 0, 1, 1], [], []>} : vector<8x32xbf16>, vector<32x32xbf16>, vector<8x32xf32> -> vector<8x32xf32>
    %152 = vector.broadcast %114 : vector<1x32xf32> to vector<8x32xf32>
    %153 = arith.addf %151, %152 : vector<8x32xf32>
    %154 = arith.addf %110, %153 : vector<8x32xf32>
    %cst_55 = arith.constant dense<0.000000e+00> : vector<8xf32>
    %155 = vector.multi_reduction <add>, %154, %cst_55 [1] : vector<8x32xf32> to vector<8xf32>
    %156 = vector.shape_cast %155 : vector<8xf32> to vector<8x1xf32>
    %cst_56 = arith.constant 3.200000e+01 : f32
    %157 = vector.broadcast %cst_56 : f32 to vector<8x1xf32>
    %158 = arith.divf %156, %157 : vector<8x1xf32>
    %159 = vector.broadcast %158 : vector<8x1xf32> to vector<8x32xf32>
    %160 = arith.subf %154, %159 : vector<8x32xf32>
    %161 = arith.mulf %160, %160 : vector<8x32xf32>
    %cst_57 = arith.constant dense<0.000000e+00> : vector<8xf32>
    %162 = vector.multi_reduction <add>, %161, %cst_57 [1] : vector<8x32xf32> to vector<8xf32>
    %163 = vector.shape_cast %162 : vector<8xf32> to vector<8x1xf32>
    %cst_58 = arith.constant 3.200000e+01 : f32
    %164 = vector.broadcast %cst_58 : f32 to vector<8x1xf32>
    %165 = arith.divf %163, %164 : vector<8x1xf32>
    %cst_59 = arith.constant 9.99999974E-6 : f32
    %166 = vector.broadcast %cst_59 : f32 to vector<8x1xf32>
    %167 = arith.addf %165, %166 : vector<8x1xf32>
    %168 = math.rsqrt %167 : vector<8x1xf32>
    %169 = vector.broadcast %168 : vector<8x1xf32> to vector<8x32xf32>
    %170 = arith.mulf %160, %169 : vector<8x32xf32>
    %171 = vector.broadcast %115 : vector<1x32xf32> to vector<8x32xf32>
    %172 = arith.mulf %170, %171 : vector<8x32xf32>
    %173 = vector.broadcast %116 : vector<1x32xf32> to vector<8x32xf32>
    %174 = arith.addf %172, %173 : vector<8x32xf32>
    %175 = arith.truncf %174 : vector<8x32xf32> to vector<8x32xbf16>
    %c1_60 = arith.constant 1 : index
    %c0_61 = arith.constant 0 : index
    %c0_62 = arith.constant 0 : index
    %176 = vector.load %arg7[%c1_60, %c0_61, %c0_62] : memref<2x32x64xbf16, #tpu.memory_space<vmem>>, vector<1x32x64xbf16>
    %177 = vector.shape_cast %176 : vector<1x32x64xbf16> to vector<32x64xbf16>
    %cst_63 = arith.constant dense<0.000000e+00> : vector<8x64xf32>
    %178 = tpu.matmul %175, %177, %cst_63 {dimension_numbers = #tpu.dot_dimension_numbers<[1], [0], [0], [1], [0, 0, 1, 1], [], []>} : vector<8x32xbf16>, vector<32x64xbf16>, vector<8x64xf32> -> vector<8x64xf32>
    %179 = vector.broadcast %117 : vector<1x64xf32> to vector<8x64xf32>
    %180 = arith.addf %178, %179 : vector<8x64xf32>
    %cst_64 = arith.constant 0.000000e+00 : f32
    %181 = vector.broadcast %cst_64 : f32 to vector<8x64xf32>
    %182 = arith.maximumf %180, %181 : vector<8x64xf32>
    %183 = arith.truncf %182 : vector<8x64xf32> to vector<8x64xbf16>
    %c1_65 = arith.constant 1 : index
    %c0_66 = arith.constant 0 : index
    %c0_67 = arith.constant 0 : index
    %184 = vector.load %arg8[%c1_65, %c0_66, %c0_67] : memref<2x64x32xbf16, #tpu.memory_space<vmem>>, vector<1x64x32xbf16>
    %185 = vector.shape_cast %184 : vector<1x64x32xbf16> to vector<64x32xbf16>
    %cst_68 = arith.constant dense<0.000000e+00> : vector<8x32xf32>
    %186 = tpu.matmul %183, %185, %cst_68 {dimension_numbers = #tpu.dot_dimension_numbers<[1], [0], [0], [1], [0, 0, 1, 1], [], []>} : vector<8x64xbf16>, vector<64x32xbf16>, vector<8x32xf32> -> vector<8x32xf32>
    %187 = vector.broadcast %118 : vector<1x32xf32> to vector<8x32xf32>
    %188 = arith.addf %186, %187 : vector<8x32xf32>
    %189 = arith.addf %174, %188 : vector<8x32xf32>
    %cst_69 = arith.constant dense<0.000000e+00> : vector<8xf32>
    %190 = vector.multi_reduction <add>, %189, %cst_69 [1] : vector<8x32xf32> to vector<8xf32>
    %191 = vector.shape_cast %190 : vector<8xf32> to vector<8x1xf32>
    %cst_70 = arith.constant 3.200000e+01 : f32
    %192 = vector.broadcast %cst_70 : f32 to vector<8x1xf32>
    %193 = arith.divf %191, %192 : vector<8x1xf32>
    %194 = vector.broadcast %193 : vector<8x1xf32> to vector<8x32xf32>
    %195 = arith.subf %189, %194 : vector<8x32xf32>
    %196 = arith.mulf %195, %195 : vector<8x32xf32>
    %cst_71 = arith.constant dense<0.000000e+00> : vector<8xf32>
    %197 = vector.multi_reduction <add>, %196, %cst_71 [1] : vector<8x32xf32> to vector<8xf32>
    %198 = vector.shape_cast %197 : vector<8xf32> to vector<8x1xf32>
    %cst_72 = arith.constant 3.200000e+01 : f32
    %199 = vector.broadcast %cst_72 : f32 to vector<8x1xf32>
    %200 = arith.divf %198, %199 : vector<8x1xf32>
    %cst_73 = arith.constant 9.99999974E-6 : f32
    %201 = vector.broadcast %cst_73 : f32 to vector<8x1xf32>
    %202 = arith.addf %200, %201 : vector<8x1xf32>
    %203 = math.rsqrt %202 : vector<8x1xf32>
    %204 = vector.broadcast %203 : vector<8x1xf32> to vector<8x32xf32>
    %205 = arith.mulf %195, %204 : vector<8x32xf32>
    %206 = vector.broadcast %119 : vector<1x32xf32> to vector<8x32xf32>
    %207 = arith.mulf %205, %206 : vector<8x32xf32>
    %208 = vector.broadcast %120 : vector<1x32xf32> to vector<8x32xf32>
    %209 = arith.addf %207, %208 : vector<8x32xf32>
    %210 = arith.truncf %209 : vector<8x32xf32> to vector<8x32xbf16>
    %c0_74 = arith.constant 0 : index
    %c0_75 = arith.constant 0 : index
    %211 = vector.load %arg10[%c0_74, %c0_75] : memref<32x128xbf16, #tpu.memory_space<vmem>>, vector<32x128xbf16>
    %cst_76 = arith.constant dense<0.000000e+00> : vector<8x128xf32>
    %212 = tpu.matmul %210, %211, %cst_76 {dimension_numbers = #tpu.dot_dimension_numbers<[1], [0], [0], [1], [0, 0, 1, 1], [], []>} : vector<8x32xbf16>, vector<32x128xbf16>, vector<8x128xf32> -> vector<8x128xf32>
    %c0_77 = arith.constant 0 : index
    %c0_78 = arith.constant 0 : index
    %213 = vector.load %arg11[%c0_77, %c0_78] : memref<1x128xf32, #tpu.memory_space<vmem>>, vector<1x128xf32>
    %214 = vector.broadcast %213 : vector<1x128xf32> to vector<8x128xf32>
    %215 = arith.addf %212, %214 : vector<8x128xf32>
    %c0_79 = arith.constant 0 : index
    %c0_80 = arith.constant 0 : index
    %216 = vector.load %arg12[%c0_79, %c0_80] : memref<8x128xf32, #tpu.memory_space<vmem>>, vector<8x128xf32>
    tpu.vector_store %arg12[%c0_79, %c0_80], %215 {strides = array<i32>} : memref<8x128xf32, #tpu.memory_space<vmem>>, vector<8x128xf32>,
    return
  }
  func.func @transform_0(%arg0: i32) -> (i32, i32) {
    %c0_i32 = arith.constant 0 : i32
    %c0_i32_0 = arith.constant 0 : i32
    return %arg0, %c0_i32 : i32, i32
  }
  func.func @transform_1(%arg0: i32) -> (i32, i32) {
    %c0_i32 = arith.constant 0 : i32
    %c0_i32_0 = arith.constant 0 : i32
    %c0_i32_1 = arith.constant 0 : i32
    return %c0_i32, %c0_i32_0 : i32, i32
  }
  func.func @transform_2(%arg0: i32) -> (i32, i32) {
    %c0_i32 = arith.constant 0 : i32
    %c0_i32_0 = arith.constant 0 : i32
    %c0_i32_1 = arith.constant 0 : i32
    return %c0_i32, %c0_i32_0 : i32, i32
  }
  func.func @transform_3(%arg0: i32) -> (i32, i32) {
    %c0_i32 = arith.constant 0 : i32
    %c0_i32_0 = arith.constant 0 : i32
    %c0_i32_1 = arith.constant 0 : i32
    return %c0_i32, %c0_i32_0 : i32, i32
  }
  func.func @transform_4(%arg0: i32) -> (i32, i32, i32) {
    %c0_i32 = arith.constant 0 : i32
    %c0_i32_0 = arith.constant 0 : i32
    %c0_i32_1 = arith.constant 0 : i32
    %c0_i32_2 = arith.constant 0 : i32
    return %c0_i32, %c0_i32_0, %c0_i32_1 : i32, i32, i32
  }
  func.func @transform_5(%arg0: i32) -> (i32, i32, i32) {
    %c0_i32 = arith.constant 0 : i32
    %c0_i32_0 = arith.constant 0 : i32
    %c0_i32_1 = arith.constant 0 : i32
    %c0_i32_2 = arith.constant 0 : i32
    return %c0_i32, %c0_i32_0, %c0_i32_1 : i32, i32, i32
  }
  func.func @transform_6(%arg0: i32) -> (i32, i32, i32) {
    %c0_i32 = arith.constant 0 : i32
    %c0_i32_0 = arith.constant 0 : i32
    %c0_i32_1 = arith.constant 0 : i32
    %c0_i32_2 = arith.constant 0 : i32
    return %c0_i32, %c0_i32_0, %c0_i32_1 : i32, i32, i32
  }
  func.func @transform_7(%arg0: i32) -> (i32, i32, i32) {
    %c0_i32 = arith.constant 0 : i32
    %c0_i32_0 = arith.constant 0 : i32
    %c0_i32_1 = arith.constant 0 : i32
    %c0_i32_2 = arith.constant 0 : i32
    return %c0_i32, %c0_i32_0, %c0_i32_1 : i32, i32, i32
  }
  func.func @transform_8(%arg0: i32) -> (i32, i32, i32) {
    %c0_i32 = arith.constant 0 : i32
    %c0_i32_0 = arith.constant 0 : i32
    %c0_i32_1 = arith.constant 0 : i32
    %c0_i32_2 = arith.constant 0 : i32
    return %c0_i32, %c0_i32_0, %c0_i32_1 : i32, i32, i32
  }
  func.func @transform_9(%arg0: i32) -> (i32, i32) {
    %c0_i32 = arith.constant 0 : i32
    %c0_i32_0 = arith.constant 0 : i32
    %c0_i32_1 = arith.constant 0 : i32
    return %c0_i32, %c0_i32_0 : i32, i32
  }
  func.func @transform_10(%arg0: i32) -> (i32, i32) {
    %c0_i32 = arith.constant 0 : i32
    %c0_i32_0 = arith.constant 0 : i32
    %c0_i32_1 = arith.constant 0 : i32
    return %c0_i32, %c0_i32_0 : i32, i32
  }
  func.func @transform_11(%arg0: i32) -> (i32, i32) {
    %c0_i32 = arith.constant 0 : i32
    %c0_i32_0 = arith.constant 0 : i32
    return %arg0, %c0_i32 : i32, i32
  }
}

</mosaic_0001>

<bundles_post_ra>
// kernel: poetry_transformer_forward.1
= control target key start
LH: loop header
LB: loop body
LE: loop exit
PB: predicated region body
PF: predicated region fallthrough
CT: control target
= control target key end

     0   :  { %s2055_s0 = inlined_call_operand.vmem [shape: s32[16,1], index: 0, kind: input, shape index: {}]   ;;  %s2056_s1 = inlined_call_operand.vmem [shape: f32[8,32], index: 1, kind: input, shape index: {}]   ;;  %s2057_s2 = inlined_call_operand.vmem [shape: f32[32,32], index: 2, kind: input, shape index: {}]   ;;  %s2058_s3 = inlined_call_operand.vmem [shape: bf16[128,32], index: 3, kind: input, shape index: {}]   ;;  %s2059_s4 = inlined_call_operand.vmem [shape: bf16[2,32,96], index: 4, kind: input, shape index: {}]   ;;  %s2060_s5 = inlined_call_operand.vmem [shape: bf16[2,32,32], index: 5, kind: input, shape index: {}]   ;;  %s2061_s6 = inlined_call_operand.vmem [shape: bf16[2,32,64], index: 6, kind: input, shape index: {}]   ;;  %s2062_s7 = inlined_call_operand.vmem [shape: bf16[2,64,32], index: 7, kind: input, shape index: {}]   ;;  %s2063_s8 = inlined_call_operand.vmem [shape: f32[2,8,128], index: 8, kind: input, shape index: {}]   ;;  %s2064_s9 = inlined_call_operand.hbm [shape: bf16[32,128], index: 9, kind: input, shape index: {}]   ;;  %s2065_s10 = inlined_call_operand.vmem [shape: f32[1,128], index: 10, kind: input, shape index: {}]   ;;  %s2066_s11 = inlined_call_operand.hbm [shape: f32[16,128], index: 11, kind: output, shape index: {}]  }
   0x1   :  { %2067 = sst [smem:[#allocation8_spill]] %s2055_s0 }
   0x2   :  { %2068 = sst [smem:[#allocation9_spill]] %s2056_s1 }
   0x3   :  { %2069 = sst [smem:[#allocation10_spill]] %s2064_s9 }
   0x4   :  { %16 = vsyncpa [#allocation3], 0 }
   0x5   :  { %17 = vsyncpa [#allocation4], 0 }
   0x6   :  { %19 = vsyncpa [#allocation4 + $0x1], 0  ;;  %s1715_s17 = smov 0   ;;  %s1717_s18 = smov 0  }
   0x7   :  { %s1719_s19 = smov 0   ;;  %s1721_s20 = smov 0  }
   0x8 LB: > { %s1736_s21 = sadd.s32 4294967295, %s1644_s20   ;;  %s1269_s22 = sadd.s32 4294967294, %s1644_s20   ;;  %s1644_s20 = sphi %s1721_s20, %s2078_s20   ;;  %s1640_s19 = sphi %s1719_s19, %s2077_s19   ;;  %s1636_s18 = sphi %s1717_s18, %s2076_s18   ;;  %s1632_s17 = sphi %s1715_s17, %s2075_s17  }
   0x9   : > { %s1740_s23 = sadd.s32 1, %s1644_s20   ;;  %s268_s24 = sadd.s32 1, %s1640_s19 }
   0xa   : > { %s265_s25 = ssub.s32 %s1644_s20, %s1740_s23  ;;  %p278_p0 = scmp.ne.s32.totalorder %s1640_s19, %s1636_s18 }
   0xb   : > { %p266_p1 = scmp.eq.s32.totalorder %s265_s25, 0  ;;  %p279_p2 = scmp.eq.s32.totalorder %s1736_s21, 1 }
   0xc   : > { %p284_p3 = scmp.ne.s32.totalorder %s1636_s18, %s1632_s17  ;;  %p285_p4 = scmp.eq.s32.totalorder %s1269_s22, 1 }
   0xd   : > { %s1751_s26 = scalar_select %p266_p1, %s1640_s19, %s268_s24  }
   0xe   : > { %p1753_p5 = por %p279_p2, %p278_p0  ;;  %p1757_p6 = por %p285_p4, %p284_p3 }
   0xf   : > { %p1270_p7 = scmp.ge.s32.totalorder %s1644_s20, 1  ;;  %p292_p8 = scmp.lt.s32.totalorder %s1644_s20, 3 }
  0x10   : > { %p1484_p9 = scmp.eq.s32.totalorder %s1736_s21, 0  ;;  %s2072_s9 = sld [smem:[#allocation10_spill]] }
  0x11   : > { %p293_p10 = pnand %p1270_p7, %p292_p8  ;;  %s1646_s13 = smov [#allocation2]  }
  0x12   : > { %s329_s14 = sshll.u32 %s1646_s13, 4  ;;  %s1647_s15 = smov 64   ;;  %s330_s14 = int_to_ptr.vmem [resolvable:$true] %s329_s14 }
  0x13   : > { %p1476_p11 = pneg %p293_p10  ;;  %s1648_s16 = smov 4  }
  0x14   : > { %355 = sbr.rel (%p293_p10) target bundleno = 3627 (0xe2b), region = 64 }
  0x15   : > { %p1477_p12 = pnand %p1484_p9, %p1476_p11 }
  0x16   : > { %s327_s12 = sshll.u32 %s2072_s9, 4  ;;  %s328_s12 = int_to_ptr.hbm [resolvable:$true] %s327_s12 }
  0x17   : > { %1479 = dma.hbm_to_vmem [thread:$0]  (!%p1477_p12), %s328_s12, 256, %s330_s14, [#allocation3], %s1647_s15, %s1647_s15, %s1648_s16  }
  0x19   : > { %1623 = dma.done.wait (%p1484_p9), [#allocation3], 256  }
  0x1a   : > { %1625 = vsyncadd (%p1484_p9), [#allocation3], 4294967040  ;;  %p395_p13 = scmp.lt.s32.totalorder %s1736_s21, 1  ;;  %v1649_v0 = vmov 0   ;;  %s2073_s0 = sld [smem:[#allocation8_spill]]  ;;  %v1447_v2 = vld [vmem:[%s2058_s3 + $0x38] sm:$0xff]  ;;  %v401_v12 = vlaneseq }
  0x1b   : > { %1528 = vset.pattern.permute.xlu0 %v1649_v0  ;;  %475 = vmatpush.bf16.msra.mxu0 %v1447_v2  ;;  %v1446_v3 = vld [vmem:[%s2058_s3 + $0x30] sm:$0xff]  ;;  %v1445_v4 = vld [vmem:[%s2058_s3 + $0x28] sm:$0xff]  ;;  %v1444_v5 = vld [vmem:[%s2058_s3 + $0x20] sm:$0xff]  ;;  %s1650_s29 = smov 32   ;;  %v1651_v15 = vmov 1.0|1.0  }
  0x1c   : > { %s396_s22 = scalar_select %p395_p13, %s1736_s21, 1  ;;  %v1443_v6 = vld [vmem:[%s2058_s3 + $0x18] sm:$0xff]  ;;  %v1442_v7 = vld [vmem:[%s2058_s3 + $0x10] sm:$0xff]  ;;  %v1441_v8 = vld [vmem:[%s2058_s3 + $0x8] sm:$0xff]  ;;  %v402_v13 = vand.u32 127, %v401_v12  ;;  %vm511_vm2 = vcmask 261120  }
  0x1d   : > { %v1440_v9 = vld [vmem:[%s2058_s3] sm:$0xff]  ;;  %v1805_v10 = vld [vmem:[%s2057_s2 + $0x18] sm:$0xff]  ;;  %v1449_v11 = vld [vmem:[%s2059_s4 + $0x8] sm:$0xff]  ;;  %s1652_s25 = smov 64   ;;  %s2074_s1 = sld [smem:[#allocation9_spill]]  ;;  %vm790_vm7 = vcmask 523264  }
  0x1e   : > { %s1276_s24 = sshll.u32 %s396_s22, 3  ;;  %538 = vrot.lane.b32.xlu1 %v1805_v10, %s1650_s29  ;;  %618 = vmatpush.msra.mxu3 %v1805_v10  ;;  %v1448_v16 = vld [vmem:[%s2059_s4] sm:$0xff]  ;;  %v1824_v18 = vld [vmem:[%s2057_s2 + $0x10] sm:$0xff]  ;;  %v1829_v19 = vld [vmem:[%s2057_s2 + $0x8] sm:$0xff]  ;;  %s1653_s13 = smov 96  }
  0x1f   : > { %476 = vmatpush.bf16.msra.mxu0 %v1446_v3  ;;  %521 = vmatpush.bf16.msra.mxu1 %v1449_v11  ;;  %v1818_v17 = vld [vmem:[%s2057_s2] sm:$0xff]  ;;  %s1437_s12 = sshll.u32 %s1736_s21, 3  ;;  %s1598_s15 = scalar_lea.hbm %s2066_s11, 16 }
  0x20   : > { %s398_s30 = scalar_lea.vmem %s2073_s0, %s1276_s24  ;;  %534 = vrot.lane.b32.xlu2 %v1829_v19, %s1650_s29  ;;  %619 = vmatpush.msra.mxu3 %v1824_v18  ;;  %v1853_v26 = vld [vmem:[%s2063_s8] sm:$0xff]  ;;  %s1193_s16 = scalar_lea.hbm %s2066_s11, %s1437_s12 }
  0x21   : > { %v400_v1 = vld [vmem:[%s398_s30] sm:$0xff]  ;;  %v498_v27 = vperm.slane %v1853_v26, 0  ;;  %s1197_s30 = sshll.u32 %s1193_s16, 4  ;;  %s1198_s30 = int_to_ptr.hbm [resolvable:$true] %s1197_s30 }
  0x22   : > { %404 = vperm.xlu0 %1528, %v400_v1   ;;  %620 = vmatpush.msra.mxu3 %v1829_v19  ;;  %v1451_v1 = vld [vmem:[%s2060_s5 + $0x8] sm:$0xff]  ;;  %v1450_v2 = vld [vmem:[%s2060_s5] sm:$0xff]  ;;  %s1592_s21 = sshra.s32 %s1198_s30, 4  ;;  %s1593_s21 = int_to_ptr.hbm [resolvable:$true] %s1592_s21 }
  0x23   : > { %477 = vmatpush.bf16.msra.mxu0 %v1445_v4  ;;  %522 = vmatpush.bf16.msra.mxu1 %v1448_v16  ;;  %v426_v20 = vld [vmem:[%s2074_s1] sm:$0xff]  ;;  %v1654_v16 = vmov 32.0   ;;  %s1594_s1 = scalar_lea.hbm %s1593_s21, 8  ;;  %p1599_p3 = scmp.lt.s32.totalorder %s1593_s21, %s2066_s11 }
  0x24   : > { %621 = vmatpush.msra.mxu3 %v1818_v17  ;;  %p1595_p0 = scmp.ne.s32.totalorder %s1593_s21, %s1594_s1  ;;  %p1600_p4 = scmp.lt.s32.totalorder %s1598_s15, %s1594_s1 }
  0x26   : > { %532 = vrot.lane.b32.xlu1 %v1818_v17, %s1650_s29  ;;  %p1596_p1 = pnand %p1595_p0, %p1753_p5  ;;  %p1601_p7 = por %p1600_p4, %p1599_p3 }
  0x27   : > { %478 = vmatpush.bf16.msra.mxu0 %v1444_v5  ;;  %680 = vmatpush.bf16.msrb.mxu1 %v1451_v1 }
  0x28   : > { %p1597_p2 = pneg %p1596_p1 }
  0x2a   : > { %536 = vrot.lane.b32.xlu0 %v1824_v18, %s1650_s29  ;;  %s392_s29 = sand.u32 1, %s1636_s18   ;;  %p1602_p8 = pnand %p1601_p7, %p1597_p2 }
  0x2b   : > { %479 = vmatpush.bf16.msra.mxu0 %v1443_v6  ;;  %681 = vmatpush.bf16.msrb.mxu1 %v1450_v2  ;;  %s1275_s14 = sshll.u32 %s392_s29, 3  ;;  %s1183_s0 = scalar_lea.sflag [#allocation4], %s392_s29 }
  0x2e   : > { %554 = vrot.lane.b32.xlu1 %v1824_v18, %s1652_s25 }
  0x2f   : > { %480 = vmatpush.bf16.msra.mxu0 %v1442_v7 }
  0x33   : > { %481 = vmatpush.bf16.msra.mxu0 %v1441_v8 }
  0x36   : > { %552 = vrot.lane.b32.xlu1 %v1829_v19, %s1652_s25 }
  0x37   : > { %482 = vmatpush.bf16.msra.mxu0 %v1440_v9  ;;  %v658_v9 = vperm.slane %v1853_v26, 1 }
  0x7a   : > { %v1856_v29 = vpop.permute.xlu2 %534 }
  0x90   : > { %v1848_v25 = vpop.permute.xlu1 %538 }
  0x94   : > { %v405_v14 = vpop.permute.xlu0 %404 }
  0x95   : > { %vm406_vm0 = vcmp.eq.s32.totalorder %v405_v14, %v402_v13 }
  0x96   : > { %vm1310_vm1 = vmpackc.low %vm406_vm0, %vm406_vm0 }
  0x97   : > { %1311 = vmatmul.msk.bf16.vlgmr.msra.gmra.mxu0 %vm1310_vm1, %v1651_v15 }
  0x98   : > { %v1860_v32 = vpop.permute.xlu1 %532 }
  0x9c   : > { %v1858_v31 = vpop.permute.xlu0 %536 }
  0xa0   : > { %v1873_v42 = vpop.permute.xlu1 %554 }
  0xa8   : > { %v1881_v49 = vpop.permute.xlu1 %552 }
 0x114   : > { %v484_v21 = vpop.f32.mrf.mxu0 }
 0x115   : > { %v1843_v22 = vadd.f32 %v484_v21, %v426_v20 }
 0x117   : > { %v493_v23 = vpack.c.bf16 %v1843_v22, %v1843_v22 }
 0x119   : > { %1320 = vmatmul.msk.bf16.vlgmr.msra.gmra.mxu1 %vm511_vm2, %v493_v23 }
 0x11c   : > { %v486_v24 = vpop.f32.mrf.mxu0 }
 0x196   : > { %v524_v28 = vpop.f32.mrf.mxu1 }
 0x197   : > { %v525_v30 = vadd.f32 %v524_v28, %v498_v27 }
 0x199   : > { %v544_v33 = vmul.f32 %v1860_v32, %v525_v30  ;;  %v545_v34 = vmul.f32 %v1856_v29, %v525_v30  ;;  %v547_v35 = vmul.f32 %v1848_v25, %v525_v30  ;;  %v546_v36 = vmul.f32 %v1858_v31, %v525_v30 }
 0x19a   : > { %v564_v44 = vmul.f32 %v1873_v42, %v525_v30  ;;  %v568_v50 = vpack.c.bf16 %v525_v30, %v525_v30  ;;  %v563_v52 = vmul.f32 %v1881_v49, %v525_v30 }
 0x19b   : > { %v548_v37 = vpack.c.bf16 %v545_v34, %v544_v33  ;;  %v549_v38 = vpack.c.bf16 %v547_v35, %v546_v36  ;;  %v1453_v36 = vld [vmem:[%s2061_s6 + $0x8] sm:$0xff] }
 0x19d   : > { %571 = vrot.lane.b32.xlu0 %v548_v37, %s1653_s13  ;;  %573 = vrot.lane.b32.xlu2 %v549_v38, %s1653_s13  ;;  %v1452_v37 = vld [vmem:[%s2061_s6] sm:$0xff]  ;;  %v1457_v38 = vld [vmem:[%s2062_s7 + $0x18] sm:$0xff] }
 0x19e   : > { %v526_v39 = vpop.f32.mrf.mxu1 }
 0x1a5   : > { %550 = vrot.lane.b32.xlu0 %v1818_v17, %s1652_s25  ;;  %556 = vrot.lane.b32.xlu2 %v1805_v10, %s1652_s25 }
 0x1f7   : > { %v574_v40 = vpop.permute.xlu2 %573 }
 0x1f8   : > { %v582_v41 = vsel %vm511_vm2, %v574_v40, 0 }
 0x1f9   : > { %590 = vmatpush.bf16.xpose.msra.mxu2 %v582_v41  ;;  %v1456_v41 = vld [vmem:[%s2062_s7 + $0x10] sm:$0xff] }
 0x1ff   : > { %v1875_v43 = vpop.permute.xlu2 %556 }
 0x200   : > { %v565_v45 = vmul.f32 %v1875_v43, %v525_v30 }
 0x202   : > { %v567_v46 = vpack.c.bf16 %v565_v45, %v564_v44 }
 0x204   : > { %631 = vrot.lane.b32.xlu0 %v567_v46, %s1652_s25 }
 0x20f   : > { %v572_v47 = vpop.permute.xlu0 %571 }
 0x210   : > { %v579_v48 = vsel %vm511_vm2, %v572_v47, 0 }
 0x211   : > { %591 = vmatpush.bf16.xpose.msra.mxu2 %v579_v48 }
 0x217   : > { %v1883_v51 = vpop.permute.xlu0 %550 }
 0x218   : > { %v562_v53 = vmul.f32 %v1883_v51, %v525_v30  ;;  %1321 = vmatmul.msk.bf16.vlgmr.msra.gmra.mxu2 %vm511_vm2, %v568_v50  ;;  %v717_v50 = vperm.slane %v1853_v26, 2 }
 0x219   : > { %748 = vmatpush.bf16.msrb.mxu2 %v1453_v36 }
 0x21a   : > { %v566_v54 = vpack.c.bf16 %v563_v52, %v562_v53 }
 0x21c   : > { %629 = vrot.lane.b32.xlu1 %v566_v54, %s1652_s25 }
 0x21d   : > { %749 = vmatpush.bf16.msrb.mxu2 %v1452_v37 }
 0x221   : > { %933 = vmatpush.msra.mxu2 %v1805_v10 }
 0x223   : > { %934 = vmatpush.msra.mxu2 %v1824_v18 }
 0x225   : > { %935 = vmatpush.msra.mxu2 %v1829_v19  ;;  %v719_v19 = vperm.slane %v1853_v26, 3 }
 0x227   : > { %936 = vmatpush.msra.mxu2 %v1818_v17 }
 0x276   : > { %v632_v55 = vpop.permute.xlu0 %631 }
 0x277   : > { %644 = vmatpush.bf16.msrb.mxu3 %v632_v55 }
 0x28e   : > { %v630_v56 = vpop.permute.xlu1 %629 }
 0x28f   : > { %645 = vmatpush.bf16.msrb.mxu3 %v630_v56  ;;  %v1455_v56 = vld [vmem:[%s2062_s7 + $0x8] sm:$0xff] }
 0x29b   : > { %v593_v57 = vpop.f32.mrf.mxu2 }
 0x29c   : > { %v597_v58 = vsel %vm511_vm2, %v593_v57, -inf }
 0x29d   : > { %598 = vmax.xlane.f32.xlu2 %v597_v58  ;;  %v726_v58 = vperm.slane %v1853_v26, 4 }
 0x2a3   : > { %v595_v59 = vpop.f32.mrf.mxu2 }
 0x310   : > { %v599_v60 = vpop.xlane.xlu2 %598 }
 0x311   : > { %v600_v61 = vsub.f32 %v593_v57, %v599_v60  ;;  %v1454_v57 = vld [vmem:[%s2062_s7] sm:$0xff] }
 0x313   : > { %v601_v62 = vmul.f32 1.442695, %v600_v61 }
 0x315   : > { %1530 = vpow2.f32 %v601_v62 }
 0x31b   : > { %v1531_v63 = vpop.eup %1530 }
 0x31c   : > { %1322 = vmatmul.msk.f32.vlgmr.msra.gmra.mxu3 %vm511_vm2, %v1531_v63  ;;  %v626_v0 = vpack.c.bf16 %v1531_v63, %v1531_v63 }
 0x31d   : > { %798 = vmatpush.bf16.msra.mxu3 %v1457_v38 }
 0x321   : > { %799 = vmatpush.bf16.msra.mxu3 %v1456_v41 }
 0x324   : > { %1323 = vmatmul.msk.bf16.vlgmr.msrb.gmra.mxu3 %vm511_vm2, %v626_v0  ;;  %v765_v0 = vperm.slane %v1853_v26, 5 }
 0x325   : > { %800 = vmatpush.bf16.msra.mxu3 %v1455_v56 }
 0x329   : > { %801 = vmatpush.bf16.msra.mxu3 %v1454_v57 }
 0x39f   : > { %v623_v3 = vpop.f32.mrf.mxu3 }
 0x3a0   : > { %1532 = vrcp.f32 %v623_v3 }
 0x3a1   : > { %1534 = vrcp.f32 %v1654_v16 }
 0x3a6   : > { %v1533_v4 = vpop.eup %1532 }
 0x3a7   : > { %v647_v5 = vpop.f32.mrf.mxu3  ;;  %v1535_v20 = vpop.eup %1534 }
 0x3a8   : > { %v652_v6 = vmul.f32 %v1533_v4, %v647_v5  ;;  %v692_v21 = vmul.f32 32.0, %v1535_v20  ;;  %vm696_vm3 = vweird.f32 %v1535_v20 }
 0x3aa   : > { %v653_v7 = vpack.c.bf16 %v652_v6, %v652_v6  ;;  %v693_v23 = vsub.f32 1.0, %v692_v21 }
 0x3ac   : > { %1332 = vmatmul.msk.bf16.vlgmr.msrb.gmra.mxu1 %vm511_vm2, %v653_v7  ;;  %v694_v24 = vmul.f32 %v1535_v20, %v693_v23 }
 0x3ae   : > { %v695_v27 = vadd.f32 %v1535_v20, %v694_v24 }
 0x3af   : > { %v649_v8 = vpop.f32.mrf.mxu3 }
 0x3b0   : > { %v1902_v28 = vsel %vm696_vm3, %v1535_v20, %v695_v27 }
 0x429   : > { %v683_v11 = vpop.f32.mrf.mxu1 }
 0x42a   : > { %v684_v12 = vadd.f32 %v683_v11, %v658_v9 }
 0x42c   : > { %v687_v13 = vadd.f32 %v684_v12, %v1843_v22  ;;  %v1459_v12 = vld [vmem:[%s2059_s4 + $0x18] sm:$0xff] }
 0x42d   : > { %864 = vmatpush.bf16.msra.mxu1 %v1459_v12 }
 0x42e   : > { %v688_v14 = vsel %vm511_vm2, %v687_v13, 0.0 }
 0x42f   : > { %689 = vadd.xlane.f32.xlu0 %v688_v14 }
 0x431   : > { %v685_v15 = vpop.f32.mrf.mxu1 }
 0x4a2   : > { %v690_v30 = vpop.xlane.xlu0 %689 }
 0x4a3   : > { %v698_v33 = vmul.f32 %v1902_v28, %v690_v30 }
 0x4a5   : > { %v699_v34 = vsub.f32 %v687_v13, %v698_v33  ;;  %v1458_v13 = vld [vmem:[%s2059_s4 + $0x10] sm:$0xff]  ;;  %v830_v33 = vperm.slane %v1853_v26, 6 }
 0x4a6   : > { %865 = vmatpush.bf16.msra.mxu1 %v1458_v13 }
 0x4a7   : > { %v700_v35 = vmul.f32 %v699_v34, %v699_v34 }
 0x4a9   : > { %v701_v22 = vsel %vm511_vm2, %v700_v35, 0.0  ;;  %v832_v35 = vperm.slane %v1853_v26, 7 }
 0x4aa   : > { %702 = vadd.xlane.f32.xlu1 %v701_v22 }
 0x51d   : > { %v703_v39 = vpop.xlane.xlu1 %702 }
 0x51e   : > { %v704_v40 = vmul.f32 %v703_v39, %v1902_v28  ;;  %v1955_v39 = vld [vmem:[%s2063_s8 + $0x8] sm:$0xff] }
 0x520   : > { %v705_v44 = vadd.f32 1e-05, %v704_v40  ;;  %v842_v40 = vperm.slane %v1955_v39, 0 }
 0x522   : > { %1536 = vrsqrt.f32 %v705_v44  ;;  %vm712_vm5 = vweird.f32 %v705_v44 }
 0x528   : > { %v1537_v10 = vpop.eup %1536 }
 0x529   : > { %v707_v45 = vmul.f32 %v1537_v10, %v705_v44  ;;  %vm713_vm4 = vweird.f32 %v1537_v10 }
 0x52a   : > { %vm714_vm6 = vmor %vm712_vm5, %vm713_vm4 }
 0x52b   : > { %v708_v46 = vmul.f32 %v1537_v10, %v707_v45 }
 0x52d   : > { %v709_v47 = vmul.f32 0.5, %v708_v46 }
 0x52f   : > { %v710_v48 = vsub.f32 1.5, %v709_v47 }
 0x531   : > { %v711_v18 = vmul.f32 %v1537_v10, %v710_v48 }
 0x533   : > { %v715_v52 = vsel %vm714_vm6, %v1537_v10, %v711_v18 }
 0x534   : > { %v716_v53 = vmul.f32 %v715_v52, %v699_v34 }
 0x536   : > { %v718_v54 = vmul.f32 %v717_v50, %v716_v53 }
 0x538   : > { %v720_v55 = vadd.f32 %v719_v19, %v718_v54 }
 0x53a   : > { %v721_v17 = vpack.c.bf16 %v720_v55, %v720_v55 }
 0x53c   : > { %1341 = vmatmul.msk.bf16.vlgmr.msrb.gmra.mxu2 %vm511_vm2, %v721_v17 }
 0x5bf   : > { %v751_v59 = vpop.f32.mrf.mxu2 }
 0x5c0   : > { %v752_v60 = vadd.f32 %v751_v59, %v726_v58 }
 0x5c2   : > { %v755_v61 = vmax.f32 %v752_v60, 0.0 }
 0x5c4   : > { %v756_v62 = vpack.c.bf16 %v755_v61, %v755_v61 }
 0x5c6   : > { %1358 = vmatmul.msk.bf16.vlgmr.msra.gmra.mxu3 %vm790_vm7, %v756_v62 }
 0x5c7   : > { %v753_v63 = vpop.f32.mrf.mxu2 }
 0x649   : > { %v803_v1 = vpop.f32.mrf.mxu3 }
 0x64a   : > { %v804_v2 = vadd.f32 %v803_v1, %v765_v0 }
 0x64c   : > { %v807_v3 = vadd.f32 %v804_v2, %v720_v55 }
 0x64e   : > { %v808_v4 = vsel %vm511_vm2, %v807_v3, 0.0 }
 0x64f   : > { %809 = vadd.xlane.f32.xlu2 %v808_v4 }
 0x651   : > { %v805_v5 = vpop.f32.mrf.mxu3 }
 0x6c2   : > { %v810_v6 = vpop.xlane.xlu2 %809 }
 0x6c3   : > { %v811_v7 = vmul.f32 %v810_v6, %v1902_v28  ;;  %v974_v6 = vperm.slane %v1955_v39, 1 }
 0x6c5   : > { %v812_v8 = vsub.f32 %v807_v3, %v811_v7 }
 0x6c7   : > { %v813_v9 = vmul.f32 %v812_v8, %v812_v8 }
 0x6c9   : > { %v814_v11 = vsel %vm511_vm2, %v813_v9, 0.0 }
 0x6ca   : > { %815 = vadd.xlane.f32.xlu2 %v814_v11 }
 0x73d   : > { %v816_v14 = vpop.xlane.xlu2 %815 }
 0x73e   : > { %v817_v15 = vmul.f32 %v816_v14, %v1902_v28 }
 0x740   : > { %v818_v16 = vadd.f32 1e-05, %v817_v15 }
 0x742   : > { %1538 = vrsqrt.f32 %v818_v16  ;;  %vm825_vm9 = vweird.f32 %v818_v16 }
 0x748   : > { %v1539_v20 = vpop.eup %1538 }
 0x749   : > { %v820_v21 = vmul.f32 %v1539_v20, %v818_v16  ;;  %vm826_vm8 = vweird.f32 %v1539_v20 }
 0x74a   : > { %vm827_vm10 = vmor %vm825_vm9, %vm826_vm8 }
 0x74b   : > { %v821_v23 = vmul.f32 %v1539_v20, %v820_v21  ;;  %v1463_v21 = vld [vmem:[%s2061_s6 + $0x18] sm:$0xff] }
 0x74c   : > { %1058 = vmatpush.bf16.msrb.mxu2 %v1463_v21 }
 0x74d   : > { %v822_v24 = vmul.f32 0.5, %v821_v23  ;;  %v1462_v23 = vld [vmem:[%s2061_s6 + $0x10] sm:$0xff] }
 0x74f   : > { %v823_v27 = vsub.f32 1.5, %v822_v24  ;;  %v1467_v24 = vld [vmem:[%s2062_s7 + $0x38] sm:$0xff] }
 0x750   : > { %1059 = vmatpush.bf16.msrb.mxu2 %v1462_v23 }
 0x751   : > { %v824_v30 = vmul.f32 %v1539_v20, %v823_v27 }
 0x753   : > { %v828_v34 = vsel %vm827_vm10, %v1539_v20, %v824_v30 }
 0x754   : > { %v829_v22 = vmul.f32 %v828_v34, %v812_v8 }
 0x756   : > { %v831_v36 = vmul.f32 %v830_v33, %v829_v22  ;;  %v1466_v33 = vld [vmem:[%s2062_s7 + $0x30] sm:$0xff] }
 0x758   : > { %v1947_v37 = vadd.f32 %v832_v35, %v831_v36 }
 0x75a   : > { %v836_v38 = vpack.c.bf16 %v1947_v37, %v1947_v37 }
 0x75c   : > { %1372 = vmatmul.msk.bf16.vlgmr.msra.gmra.mxu1 %vm511_vm2, %v836_v38 }
 0x7d9   : > { %v867_v41 = vpop.f32.mrf.mxu1 }
 0x7da   : > { %v868_v44 = vadd.f32 %v867_v41, %v842_v40  ;;  %v1026_v41 = vperm.slane %v1955_v39, 2 }
 0x7dc   : > { %v873_v26 = vmul.f32 %v868_v44, %v1858_v31  ;;  %v874_v10 = vmul.f32 %v868_v44, %v1848_v25  ;;  %v871_v45 = vmul.f32 %v868_v44, %v1860_v32  ;;  %v872_v46 = vmul.f32 %v868_v44, %v1856_v29 }
 0x7dd   : > { %v877_v50 = vmul.f32 %v868_v44, %v1883_v51  ;;  %v878_v52 = vmul.f32 %v868_v44, %v1881_v49  ;;  %v883_v19 = vpack.c.bf16 %v868_v44, %v868_v44  ;;  %v879_v49 = vmul.f32 %v868_v44, %v1873_v42  ;;  %v1461_v42 = vld [vmem:[%s2060_s5 + $0x18] sm:$0xff] }
 0x7de   : > { %v876_v47 = vpack.c.bf16 %v874_v10, %v873_v26  ;;  %v875_v48 = vpack.c.bf16 %v872_v46, %v871_v45  ;;  %v880_v17 = vmul.f32 %v868_v44, %v1875_v43  ;;  %996 = vmatpush.bf16.msrb.mxu1 %v1461_v42  ;;  %v1460_v43 = vld [vmem:[%s2060_s5 + $0x10] sm:$0xff]  ;;  %v1028_v26 = vperm.slane %v1955_v39, 3 }
 0x7df   : > { %v881_v53 = vpack.c.bf16 %v878_v52, %v877_v50  ;;  %v1036_v50 = vperm.slane %v1955_v39, 4 }
 0x7e0   : > { %888 = vrot.lane.b32.xlu2 %v876_v47, %s1653_s13  ;;  %886 = vrot.lane.b32.xlu0 %v875_v48, %s1653_s13  ;;  %v882_v56 = vpack.c.bf16 %v880_v17, %v879_v49  ;;  %v1465_v48 = vld [vmem:[%s2062_s7 + $0x28] sm:$0xff] }
 0x7e1   : > { %v869_v18 = vpop.f32.mrf.mxu1 }
 0x7e2   : > { %997 = vmatpush.bf16.msrb.mxu1 %v1460_v43  ;;  %v1464_v18 = vld [vmem:[%s2062_s7 + $0x20] sm:$0xff] }
 0x7e8   : > { %944 = vrot.lane.b32.xlu0 %v881_v53, %s1652_s25 }
 0x83a   : > { %v889_v31 = vpop.permute.xlu2 %888 }
 0x83b   : > { %v897_v25 = vsel %vm511_vm2, %v889_v31, 0 }
 0x83c   : > { %905 = vmatpush.bf16.xpose.msrb.mxu0 %v897_v25 }
 0x852   : > { %v887_v32 = vpop.permute.xlu0 %886 }
 0x853   : > { %v894_v29 = vsel %vm511_vm2, %v887_v32, 0 }
 0x854   : > { %906 = vmatpush.bf16.xpose.msrb.mxu0 %v894_v29  ;;  %v1076_v29 = vperm.slane %v1955_v39, 5 }
 0x85a   : > { %v945_v62 = vpop.permute.xlu0 %944 }
 0x85b   : > { %1373 = vmatmul.msk.bf16.vlgmr.msrb.gmra.mxu0 %vm511_vm2, %v883_v19 }
 0x85c   : > { %1108 = vmatpush.bf16.msra.mxu0 %v1467_v24 }
 0x860   : > { %1109 = vmatpush.bf16.msra.mxu0 %v1466_v33 }
 0x864   : > { %1110 = vmatpush.bf16.msra.mxu0 %v1465_v48 }
 0x868   : > { %1111 = vmatpush.bf16.msra.mxu0 %v1464_v18 }
 0x8d8   : > { %v908_v54 = vpop.f32.mrf.mxu0 }
 0x8d9   : > { %v912_v55 = vsel %vm511_vm2, %v908_v54, -inf }
 0x8da   : > { %913 = vmax.xlane.f32.xlu1 %v912_v55 }
 0x8e0   : > { %v910_v51 = vpop.f32.mrf.mxu0 }
 0x8f3   : > { %946 = vrot.lane.b32.xlu1 %v882_v56, %s1652_s25  ;;  %s394_s25 = scalar_lea.vmem [#allocation5], %s1275_s14 }
 0x8f4   : > { %s1195_s24 = sshll.u32 %s394_s25, 4  ;;  %s1196_s24 = int_to_ptr.vmem [resolvable:$true] %s1195_s24 }
 0x94d   : > { %v914_v57 = vpop.xlane.xlu1 %913 }
 0x94e   : > { %v915_v58 = vsub.f32 %v908_v54, %v914_v57 }
 0x950   : > { %v916_v59 = vmul.f32 1.442695, %v915_v58 }
 0x952   : > { %1540 = vpow2.f32 %v916_v59 }
 0x958   : > { %v1541_v60 = vpop.eup %1540 }
 0x959   : > { %1374 = vmatmul.msk.f32.vlgmr.msra.gmra.mxu2 %vm511_vm2, %v1541_v60  ;;  %v941_v63 = vpack.c.bf16 %v1541_v60, %v1541_v60  ;;  %v1469_v60 = vld [vmem:[#allocation2 + $0x8] sm:$0xff] }
 0x965   : > { %v947_v61 = vpop.permute.xlu1 %946 }
 0x966   : > { %959 = vmatpush.bf16.msrb.mxu3 %v947_v61  ;;  %v1468_v61 = vld [vmem:[#allocation2] sm:$0xff] }
 0x96a   : > { %960 = vmatpush.bf16.msrb.mxu3 %v945_v62 }
 0x96d   : > { %1375 = vmatmul.msk.bf16.vlgmr.msrb.gmra.mxu3 %vm511_vm2, %v941_v63 }
 0x96e   : > { %1174 = vmatpush.bf16.msra.mxu3 %v1469_v60 }
 0x972   : > { %1175 = vmatpush.bf16.msra.mxu3 %v1468_v61 }
 0x9dc   : > { %v938_v0 = vpop.f32.mrf.mxu2 }
 0x9dd   : > { %1542 = vrcp.f32 %v938_v0 }
 0x9e3   : > { %v1543_v1 = vpop.eup %1542 }
 0x9f0   : > { %v962_v2 = vpop.f32.mrf.mxu3 }
 0x9f1   : > { %v967_v3 = vmul.f32 %v1543_v1, %v962_v2 }
 0x9f3   : > { %v968_v4 = vpack.c.bf16 %v967_v3, %v967_v3 }
 0x9f5   : > { %1388 = vmatmul.msk.bf16.vlgmr.msrb.gmra.mxu1 %vm511_vm2, %v968_v4 }
 0x9f8   : > { %v964_v5 = vpop.f32.mrf.mxu3 }
 0x9f9   : > { %v1140_v5 = vperm.slane %v1955_v39, 6 }
 0xa72   : > { %v999_v7 = vpop.f32.mrf.mxu1 }
 0xa73   : > { %v1000_v8 = vadd.f32 %v999_v7, %v974_v6 }
 0xa75   : > { %v1003_v9 = vadd.f32 %v1000_v8, %v1947_v37  ;;  %v1142_v8 = vperm.slane %v1955_v39, 7 }
 0xa77   : > { %v1004_v11 = vsel %vm511_vm2, %v1003_v9, 0.0 }
 0xa78   : > { %1005 = vadd.xlane.f32.xlu2 %v1004_v11 }
 0xa7a   : > { %v1001_v12 = vpop.f32.mrf.mxu1 }
 0xa7b   : > { %v1529_v12 = vld [vmem:[%s2065_s10] ss:$0 sm:$0xff] }
 0xaeb   : > { %v1006_v13 = vpop.xlane.xlu2 %1005 }
 0xaec   : > { %v1007_v14 = vmul.f32 %v1006_v13, %v1902_v28 }
 0xaee   : > { %v1008_v15 = vsub.f32 %v1003_v9, %v1007_v14 }
 0xaf0   : > { %v1009_v16 = vmul.f32 %v1008_v15, %v1008_v15 }
 0xaf2   : > { %v1010_v20 = vsel %vm511_vm2, %v1009_v16, 0.0 }
 0xaf3   : > { %1011 = vadd.xlane.f32.xlu0 %v1010_v20 }
 0xb66   : > { %v1012_v27 = vpop.xlane.xlu0 %1011 }
 0xb67   : > { %v1013_v30 = vmul.f32 %v1012_v27, %v1902_v28 }
 0xb69   : > { %v1014_v34 = vadd.f32 1e-05, %v1013_v30 }
 0xb6b   : > { %1544 = vrsqrt.f32 %v1014_v34  ;;  %vm1021_vm12 = vweird.f32 %v1014_v34 }
 0xb71   : > { %v1545_v35 = vpop.eup %1544 }
 0xb72   : > { %v1016_v22 = vmul.f32 %v1545_v35, %v1014_v34  ;;  %vm1022_vm11 = vweird.f32 %v1545_v35 }
 0xb73   : > { %vm1023_vm13 = vmor %vm1021_vm12, %vm1022_vm11 }
 0xb74   : > { %v1017_v36 = vmul.f32 %v1545_v35, %v1016_v22 }
 0xb76   : > { %v1018_v37 = vmul.f32 0.5, %v1017_v36 }
 0xb78   : > { %v1019_v38 = vsub.f32 1.5, %v1018_v37 }
 0xb7a   : > { %v1020_v40 = vmul.f32 %v1545_v35, %v1019_v38 }
 0xb7c   : > { %v1024_v44 = vsel %vm1023_vm13, %v1545_v35, %v1020_v40 }
 0xb7d   : > { %v1025_v10 = vmul.f32 %v1024_v44, %v1008_v15 }
 0xb7f   : > { %v1027_v45 = vmul.f32 %v1026_v41, %v1025_v10 }
 0xb81   : > { %v1029_v46 = vadd.f32 %v1028_v26, %v1027_v45 }
 0xb83   : > { %v1030_v47 = vpack.c.bf16 %v1029_v46, %v1029_v46 }
 0xb85   : > { %1401 = vmatmul.msk.bf16.vlgmr.msrb.gmra.mxu2 %vm511_vm2, %v1030_v47 }
 0xc08   : > { %v1061_v52 = vpop.f32.mrf.mxu2 }
 0xc09   : > { %v1062_v53 = vadd.f32 %v1061_v52, %v1036_v50 }
 0xc0b   : > { %v1065_v31 = vmax.f32 %v1062_v53, 0.0 }
 0xc0d   : > { %v1066_v25 = vpack.c.bf16 %v1065_v31, %v1065_v31 }
 0xc0f   : > { %1426 = vmatmul.msk.bf16.vlgmr.msra.gmra.mxu0 %vm790_vm7, %v1066_v25 }
 0xc10   : > { %v1063_v32 = vpop.f32.mrf.mxu2 }
 0xc8c   : > { %v1113_v19 = vpop.f32.mrf.mxu0 }
 0xc8d   : > { %v1114_v54 = vadd.f32 %v1113_v19, %v1076_v29 }
 0xc8f   : > { %v1117_v55 = vadd.f32 %v1114_v54, %v1029_v46 }
 0xc91   : > { %v1118_v51 = vsel %vm511_vm2, %v1117_v55, 0.0 }
 0xc92   : > { %1119 = vadd.xlane.f32.xlu1 %v1118_v51 }
 0xc94   : > { %v1115_v49 = vpop.f32.mrf.mxu0 }
 0xd05   : > { %v1120_v17 = vpop.xlane.xlu1 %1119 }
 0xd06   : > { %v1121_v56 = vmul.f32 %v1120_v17, %v1902_v28 }
 0xd08   : > { %v1122_v57 = vsub.f32 %v1117_v55, %v1121_v56 }
 0xd0a   : > { %v1123_v58 = vmul.f32 %v1122_v57, %v1122_v57 }
 0xd0c   : > { %v1124_v59 = vsel %vm511_vm2, %v1123_v58, 0.0 }
 0xd0d   : > { %1125 = vadd.xlane.f32.xlu2 %v1124_v59 }
 0xd80   : > { %v1126_v62 = vpop.xlane.xlu2 %1125 }
 0xd81   : > { %v1127_v63 = vmul.f32 %v1126_v62, %v1902_v28 }
 0xd83   : > { %v1128_v42 = vadd.f32 1e-05, %v1127_v63 }
 0xd85   : > { %1546 = vrsqrt.f32 %v1128_v42  ;;  %vm1135_vm15 = vweird.f32 %v1128_v42 }
 0xd8b   : > { %v1547_v43 = vpop.eup %1546 }
 0xd8c   : > { %v1130_v0 = vmul.f32 %v1547_v43, %v1128_v42  ;;  %vm1136_vm14 = vweird.f32 %v1547_v43 }
 0xd8d   : > { %vm1137_vm0 = vmor %vm1135_vm15, %vm1136_vm14 }
 0xd8e   : > { %v1131_v1 = vmul.f32 %v1547_v43, %v1130_v0 }
 0xd90   : > { %v1132_v2 = vmul.f32 0.5, %v1131_v1 }
 0xd92   : > { %v1133_v3 = vsub.f32 1.5, %v1132_v2 }
 0xd94   : > { %v1134_v4 = vmul.f32 %v1547_v43, %v1133_v3 }
 0xd96   : > { %v1138_v6 = vsel %vm1137_vm0, %v1547_v43, %v1134_v4 }
 0xd97   : > { %v1139_v7 = vmul.f32 %v1138_v6, %v1122_v57 }
 0xd99   : > { %v1141_v28 = vmul.f32 %v1140_v5, %v1139_v7 }
 0xd9b   : > { %v1143_v9 = vadd.f32 %v1142_v8, %v1141_v28 }
 0xd9d   : > { %v1144_v11 = vpack.c.bf16 %v1143_v9, %v1143_v9 }
 0xd9f   : > { %1435 = vmatmul.msk.bf16.vlgmr.msra.gmra.mxu3 %vm511_vm2, %v1144_v11 }
 0xe22   : > { %v1177_v39 = vpop.f32.mrf.mxu3 }
 0xe23   : > { %v1178_v13 = vadd.f32 %v1529_v12, %v1177_v39 }
 0xe25   : > { %1181 = vst [vmem:[%s394_s25] sm:$0xff] %v1178_v13 }
 0xe26   : > { %1605 = shalt.err (!%p1602_p8)
}
 0xe27   : > { %1474 = dma.vmem_to_hbm [thread:$0]  (%p1753_p5), %s1196_s24, 128, %s1198_s30, %s1183_s0  }
 0xe2a   : > { %v1179_v14 = vpop.f32.mrf.mxu3 }
 0xe2b PF: > { %p1486_p9 = scmp.ge.s32.totalorder %s1644_s20, 2  ;;  %s1209_s29 = sand.u32 1, %s1632_s17  }
 0xe2c   : > { %s1210_s16 = scalar_lea.sflag [#allocation4], %s1209_s29 }
 0xe2d   : > { %p1481_p10 = pnand %p1486_p9, %p1757_p6 }
 0xe2f   : > { %p1482_p11 = pneg %p1481_p10 }
 0xe31   : > { %1627 = dma.done.wait (%p1482_p11), %s1210_s16, 128  }
 0xe32   : > { %1629 = vsyncadd (%p1482_p11), %s1210_s16, 4294967168  ;;  %p22_p12 = scmp.ge.s32.totalorder %s1740_s23, 4   ;;  %s2075_s17 = smov %s1636_s18 }
 0xe33   : > { %s2076_s18 = smov %s1640_s19  ;;  %s2077_s19 = smov %s1751_s26 }
 0xe34   : > { %s2078_s20 = smov %s1740_s23  ;;  %24 = sbr.rel (!%p22_p12) target bundleno = 8 (0x8), region = 109 }
 0xe39   :  { %1216 = vsyncpa [#allocation3], 1 }
 0xe3a   :  { %1218 = vsyncpa [#allocation3 + $0x1], 1 }
 0xe3b   :  { %1219 = vsyncpa [#allocation4], 1 }
 0xe3c   :  { %1221 = vsyncpa [#allocation4 + $0x1], 1 }

</bundles_post_ra>
